<compile_context>
chip_gen: v7x
topology: tpu7x:2x2x1
jax: 0.10.0
libtpu: 0.0.40
codegen_flags: <defaults>
</compile_context>

<pallas_src>
import functools
import math

import jax
import jax.numpy as jnp
from jax import lax
from jax.experimental import pallas as pl
from jax.experimental.pallas import tpu as pltpu

LANES = 128
SUBLANES = 8
_NUM_SHARDS = 2               # leading "parallel" grid axis -> both TCs on megacore parts
_DEFAULT_BLOCK_ROWS = 2048    # (2048,128) f32 = 1 MiB per stream per buffer


def _hybrid_loss_kernel(*refs, n_elems, tb, blocks_per_shard, has_uncertainty):
    """Accumulate per-term sum-of-squares partials into a lane-dense VMEM output tile.

    refs = (t, p, a, q[, mean, std], out)
      inputs : [tb, 128] blocks (any float dtype; cast to f32 in-kernel)
      out    : [1, NT, 8, 128] f32 block, VMEM-resident across the inner reduction axis.
    """
    if has_uncertainty:
        t_ref, p_ref, a_ref, q_ref, m_ref, s_ref, out_ref = refs
    else:
        t_ref, p_ref, a_ref, q_ref, out_ref = refs
        m_ref = s_ref = None

    c = pl.program_id(0)   # shard ("parallel")
    i = pl.program_id(1)   # row-block within shard ("arbitrary" reduction axis)

    @pl.when(i == 0)
    def _init():
        out_ref[...] = jnp.zeros_like(out_ref)

    # Intended (unclamped) global row offset of this block. Blocks whose intended range
    # falls past the real data (clamped repeats, padded tail, partial DMA blocks with
    # stale VMEM rows) take the masked path and contribute exactly zero.
    start_row = (c * blocks_per_shard + i) * tb

    def fold(x):
        # (tb,128) -> (8,128) using only vreg-wise VPU adds (no cross-lane XLU work, no
        # scalar SMEM round-trips). The single cross-lane reduce happens in the wrapper.
        return x.reshape(tb // SUBLANES, SUBLANES, LANES).sum(axis=0)

    def accumulate(mask):
        def msk(x):
            return x if mask is None else jnp.where(mask, x, 0.0)

        # TODO(synk): PyTorch sanitizes (and prints warnings) only when NaNs are present;
        # here sanitization is applied unconditionally and no warnings are emitted.
        t = jnp.nan_to_num(t_ref[...].astype(jnp.float32), nan=0.0)
        p = jnp.nan_to_num(p_ref[...].astype(jnp.float32), nan=0.0)
        a = a_ref[...].astype(jnp.float32)
        q = q_ref[...].astype(jnp.float32)

        dp = p - t
        da = a - t
        dq = q - t
        out_ref[0, 0] = out_ref[0, 0] + fold(msk(dp * dp))
        out_ref[0, 1] = out_ref[0, 1] + fold(msk(da * da))
        out_ref[0, 2] = out_ref[0, 2] + fold(msk(dq * dq))

        if has_uncertainty:
            mean = jnp.nan_to_num(m_ref[...].astype(jnp.float32), nan=0.0)
            std = jnp.clip(s_ref[...].astype(jnp.float32), 1e-6, 10.0)
            var = std * std
            log_term = jnp.clip(jnp.log(2.0 * math.pi * var + 1e-8), -10.0, 10.0)
            diff = t - mean
            # Exact divide kept: pl.reciprocal(approx=True) can exceed the 1e-5 rtol.
            var_term = jnp.minimum(diff * diff / (var + 1e-8), 100.0)
            out_ref[0, 3] = out_ref[0, 3] + fold(msk(0.5 * log_term + 0.5 * var_term))

    fully_valid = (start_row + tb) * LANES <= n_elems

    @pl.when(fully_valid)
    def _unmasked():         # full blocks: no iota / compare / select work at all
        accumulate(None)

    @pl.when(jnp.logical_not(fully_valid))
    def _masked():           # boundary / padded / clamped blocks only
        rows = start_row + lax.broadcasted_iota(jnp.int32, (tb, LANES), 0)
        cols = lax.broadcasted_iota(jnp.int32, (tb, LANES), 1)
        accumulate(rows * LANES + cols < n_elems)


def hybrid_loss_forward(outputs, targets, alpha=0.7, beta=0.2, gamma=0.1,
                        block_rows=_DEFAULT_BLOCK_ROWS):
    """Pallas implementation of HybridLoss.forward (eval mode)."""
    prediction = outputs["prediction"]
    autoformer = outputs["autoformer_pred"]
    patchtst = outputs["patchtst_pred"]
    uncertainty = outputs.get("uncertainty", None)
    has_unc = uncertainty is not None

    streams = [targets, prediction, autoformer, patchtst]
    if has_unc:
        streams += [uncertainty["mean"], uncertainty["std"]]
    streams = [jnp.asarray(x) for x in streams]

    n_elems = int(streams[0].size)
    num_terms = 4 if has_unc else 3

    # Sub-32-bit inputs (e.g. bf16) need a 16-row sublane tile; 32-bit needs 8.
    min_isize = min(x.dtype.itemsize for x in streams)
    gran = SUBLANES if min_isize >= 4 else (16 if min_isize == 2 else 32)

    rows = pl.cdiv(n_elems, LANES)
    r_pad = ((rows + gran - 1) // gran) * gran
    n_pack = r_pad * LANES

    def pack(x):
        flat = x.reshape(-1)
        if n_pack != n_elems:
            # TODO(synk): only hit when n_elems is not a multiple of gran*128; the aligned
            # case is a free reshape (no extra HBM traffic). A manual-DMA bulk/tail split
            # would remove this pad for unaligned sizes too.
            flat = jnp.pad(flat, (0, n_pack - n_elems))
        return flat.reshape(r_pad, LANES)

    packed = [pack(x) for x in streams]

    tb = min(int(block_rows), r_pad)
    tb = max(gran, (tb // gran) * gran)
    n_blocks = pl.cdiv(r_pad, tb)
    num_shards = min(_NUM_SHARDS, n_blocks)
    blocks_per_shard = pl.cdiv(n_blocks, num_shards)
    grid = (num_shards, blocks_per_shard)

    def row_index_map(c, i):
        # Clamp so the DMA never walks past the packed array; clamped (repeated) blocks
        # are fully masked out inside the kernel (their intended offset is >= n_elems).
        return (jnp.minimum(c * blocks_per_shard + i, n_blocks - 1), 0)

    in_specs = [pl.BlockSpec((tb, LANES), row_index_map) for _ in packed]
    out_spec = pl.BlockSpec((1, num_terms, SUBLANES, LANES), lambda c, i: (c, 0, 0, 0))

    kernel = functools.partial(
        _hybrid_loss_kernel,
        n_elems=n_elems, tb=tb, blocks_per_shard=blocks_per_shard,
        has_uncertainty=has_unc)

    bytes_in = sum(int(x.size) * x.dtype.itemsize for x in packed)
    cost = pl.CostEstimate(
        flops=(20 if has_unc else 9) * n_elems,
        transcendentals=n_elems if has_unc else 0,
        bytes_accessed=bytes_in + num_shards * num_terms * SUBLANES * LANES * 4)

    partials = pl.pallas_call(
        kernel,
        out_shape=jax.ShapeDtypeStruct((num_shards, num_terms, SUBLANES, LANES), jnp.float32),
        grid_spec=pltpu.PrefetchScalarGridSpec(
            num_scalar_prefetch=0,
            grid=grid,
            in_specs=in_specs,
            out_specs=out_spec),
        compiler_params=pltpu.CompilerParams(
            dimension_semantics=("parallel", "arbitrary"),
            vmem_limit_bytes=32 * 1024 * 1024),
        cost_estimate=cost,
    )(*packed)

    # Final cross-lane reduce, means, NaN guards, and weighting on <=8K floats (plain XLA).
    sums = jnp.sum(partials, axis=(0, 2, 3))   # (num_terms,)
    inv_n = jnp.float32(1.0 / n_elems)
    one = jnp.float32(1.0)

    main = sums[0] * inv_n
    auto = sums[1] * inv_n
    patch = sums[2] * inv_n
    main = jnp.where(jnp.isnan(main), one, main)
    auto = jnp.where(jnp.isnan(auto), one, auto)
    patch = jnp.where(jnp.isnan(patch), one, patch)
    individual = 0.5 * (auto + patch)
    if has_unc:
        unc = sums[3] * inv_n
        unc = jnp.where(jnp.isnan(unc), jnp.float32(0.0), unc)
    else:
        unc = jnp.float32(0.0)
    total = alpha * main + beta * individual + gamma * unc
    total = jnp.where(jnp.isnan(total), main, total)

    return {"total_loss": total, "main_loss": main,
            "individual_loss": individual, "uncertainty_loss": unc}


def _reference(outputs, targets, alpha=0.7, beta=0.2, gamma=0.1):
    """Plain-JAX reference mirroring the PyTorch module."""
    t = jnp.nan_to_num(jnp.asarray(targets, jnp.float32), nan=0.0)
    p = jnp.nan_to_num(jnp.asarray(outputs["prediction"], jnp.float32), nan=0.0)
    main = jnp.mean((p - t) ** 2)
    main = jnp.where(jnp.isnan(main), 1.0, main)
    auto = jnp.mean((jnp.asarray(outputs["autoformer_pred"], jnp.float32) - t) ** 2)
    patch = jnp.mean((jnp.asarray(outputs["patchtst_pred"], jnp.float32) - t) ** 2)
    auto = jnp.where(jnp.isnan(auto), 1.0, auto)
    patch = jnp.where(jnp.isnan(patch), 1.0, patch)
    individual = 0.5 * (auto + patch)
    unc = jnp.float32(0.0)
    if outputs.get("uncertainty", None) is not None:
        mean = jnp.nan_to_num(jnp.asarray(outputs["uncertainty"]["mean"], jnp.float32), nan=0.0)
        std = jnp.clip(jnp.asarray(outputs["uncertainty"]["std"], jnp.float32), 1e-6, 10.0)
        log_term = jnp.clip(jnp.log(2.0 * jnp.pi * std * std + 1e-8), -10.0, 10.0)
        var_term = jnp.minimum((t - mean) ** 2 / (std * std + 1e-8), 100.0)
        unc = jnp.mean(0.5 * log_term + 0.5 * var_term)
        unc = jnp.where(jnp.isnan(unc), 0.0, unc)
    total = alpha * main + beta * individual + gamma * unc
    total = jnp.where(jnp.isnan(total), main, total)
    return {"total_loss": total, "main_loss": main,
            "individual_loss": individual, "uncertainty_loss": unc}


if __name__ == "__main__":
    key = jax.random.PRNGKey(0)

    def make_inputs(k, B, pred_len, with_unc=True, with_nans=True):
        ks = jax.random.split(k, 6)
        targets = jax.random.normal(ks[0], (B, pred_len, 1), jnp.float32)
        prediction = targets + 0.1 * jax.random.normal(ks[1], (B, pred_len, 1), jnp.float32)
        autoformer = targets + 0.2 * jax.random.normal(ks[2], (B, pred_len, 1), jnp.float32)
        patchtst = targets + 0.3 * jax.random.normal(ks[3], (B, pred_len, 1), jnp.float32)
        mean_pred = targets + 0.15 * jax.random.normal(ks[4], (B, pred_len, 1), jnp.float32)
        std_pred = 0.05 + 0.5 * jnp.abs(jax.random.normal(ks[5], (B, pred_len, 1), jnp.float32))
        if with_nans:
            targets = targets.at[0, 0, 0].set(jnp.nan)        # sanitized to 0
            prediction = prediction.at[1, 2, 0].set(jnp.nan)  # sanitized to 0
            autoformer = autoformer.at[2, 5, 0].set(jnp.nan)  # autoformer_loss -> 1.0 guard
        outputs = {
            "prediction": prediction,
            "autoformer_pred": autoformer,
            "patchtst_pred": patchtst,
            "uncertainty": {"mean": mean_pred, "std": std_pred} if with_unc else None,
        }
        return outputs, targets

    def check(got, want):
        got = jax.tree_util.tree_map(jax.block_until_ready, got)
        for name in ("total_loss", "main_loss", "individual_loss", "uncertainty_loss"):
            g, w = got[name], want[name]
            assert bool(jnp.isfinite(g)), (name, g)
            assert bool(jnp.allclose(g, w, atol=1e-5, rtol=1e-5)), (name, g, w)

    k1, k2, k3 = jax.random.split(key, 3)

    # 1) Small case with uncertainty + NaN-guard paths (single block, masked tail).
    outputs, targets = make_inputs(k1, B=4, pred_len=24, with_unc=True)
    check(hybrid_loss_forward(outputs, targets), _reference(outputs, targets))

    # 2) No-uncertainty path: 4-stream kernel, no dummy mean/std DMAs.
    outputs_nu, targets_nu = make_inputs(k2, B=4, pred_len=24, with_unc=False)
    check(hybrid_loss_forward(outputs_nu, targets_nu), _reference(outputs_nu, targets_nu))

    # 3) Multi-block + two-shard split + padded tail: small block_rows override so the
    #    unmasked fast path, the masked boundary block, and the parallel axis all execute.
    outputs_mb, targets_mb = make_inputs(k3, B=8, pred_len=200, with_unc=True, with_nans=False)
    check(hybrid_loss_forward(outputs_mb, targets_mb, block_rows=8),
          _reference(outputs_mb, targets_mb))

    print("KERNEL_OK")
</pallas_src>

<mosaic_0001>
module attributes {stable_mosaic.version = 11 : i64} {
  func.func @_hybrid_loss_kernel(%arg0: i32, %arg1: i32, %arg2: memref<8x128xf32, #tpu.memory_space<vmem>>, %arg3: memref<8x128xf32, #tpu.memory_space<vmem>>, %arg4: memref<8x128xf32, #tpu.memory_space<vmem>>, %arg5: memref<8x128xf32, #tpu.memory_space<vmem>>, %arg6: memref<8x128xf32, #tpu.memory_space<vmem>>, %arg7: memref<8x128xf32, #tpu.memory_space<vmem>>, %arg8: memref<1x4x8x128xf32, #tpu.memory_space<vmem>>) attributes {dimension_semantics = [#tpu.dimension_semantics<parallel>, #tpu.dimension_semantics<arbitrary>], iteration_bounds = array<i64: 1, 1>, scalar_prefetch = 0 : i64, scratch_operands = 0 : i64, tpu.core_type = #tpu.core_type<tc>, window_params = [{transform_indices = @transform_0, window_bounds = array<i64: 8, 128>}, {transform_indices = @transform_1, window_bounds = array<i64: 8, 128>}, {transform_indices = @transform_2, window_bounds = array<i64: 8, 128>}, {transform_indices = @transform_3, window_bounds = array<i64: 8, 128>}, {transform_indices = @transform_4, window_bounds = array<i64: 8, 128>}, {transform_indices = @transform_5, window_bounds = array<i64: 8, 128>}, {transform_indices = @transform_6, window_bounds = array<i64: 1, 4, 8, 128>}]} {
    %c0_i32 = arith.constant 0 : i32
    %0 = arith.cmpi eq, %arg1, %c0_i32 : i32
    %1 = arith.extui %0 : i1 to i32
    %c0_i32_0 = arith.constant 0 : i32
    %2 = arith.cmpi ne, %1, %c0_i32_0 : i32
    scf.if %2 {
      %cst = arith.constant 0.000000e+00 : f32
      %14 = vector.broadcast %cst : f32 to vector<1x4x8x128xf32>
      %c0 = arith.constant 0 : index
      %c0_4 = arith.constant 0 : index
      %c0_5 = arith.constant 0 : index
      %c0_6 = arith.constant 0 : index
      %15 = vector.load %arg8[%c0, %c0_4, %c0_5, %c0_6] : memref<1x4x8x128xf32, #tpu.memory_space<vmem>>, vector<1x4x8x128xf32>
      tpu.vector_store %arg8[%c0, %c0_4, %c0_5, %c0_6], %14 {strides = array<i32>} : memref<1x4x8x128xf32, #tpu.memory_space<vmem>>, vector<1x4x8x128xf32>,
    } else {
    }
    %c1_i32 = arith.constant 1 : i32
    %3 = arith.muli %arg0, %c1_i32 : i32
    %4 = arith.addi %3, %arg1 : i32
    %c8_i32 = arith.constant 8 : i32
    %5 = arith.muli %4, %c8_i32 : i32
    %c8_i32_1 = arith.constant 8 : i32
    %6 = arith.addi %5, %c8_i32_1 : i32
    %c128_i32 = arith.constant 128 : i32
    %7 = arith.muli %6, %c128_i32 : i32
    %c96_i32 = arith.constant 96 : i32
    %8 = arith.cmpi sle, %7, %c96_i32 : i32
    %9 = arith.extui %8 : i1 to i32
    %c0_i32_2 = arith.constant 0 : i32
    %10 = arith.cmpi ne, %9, %c0_i32_2 : i32
    scf.if %10 {
      %c0 = arith.constant 0 : index
      %c0_4 = arith.constant 0 : index
      %14 = vector.load %arg2[%c0, %c0_4] : memref<8x128xf32, #tpu.memory_space<vmem>>, vector<8x128xf32>
      %cst = arith.constant 0.000000e+00 : f32
      %15 = arith.cmpf one, %14, %14 : vector<8x128xf32>
      %16 = vector.broadcast %cst : f32 to vector<8x128xf32>
      %17 = arith.select %15, %16, %14 : vector<8x128xi1>, vector<8x128xf32>
      %cst_5 = arith.constant 0x7F800000 : f32
      %18 = vector.broadcast %cst_5 : f32 to vector<8x128xf32>
      %19 = arith.cmpf oeq, %17, %18 : vector<8x128xf32>
      %cst_6 = arith.constant 3.40282347E+38 : f32
      %20 = vector.broadcast %cst_6 : f32 to vector<8x128xf32>
      %21 = arith.select %19, %20, %17 : vector<8x128xi1>, vector<8x128xf32>
      %cst_7 = arith.constant 0xFF800000 : f32
      %22 = vector.broadcast %cst_7 : f32 to vector<8x128xf32>
      %23 = arith.cmpf oeq, %21, %22 : vector<8x128xf32>
      %cst_8 = arith.constant -3.40282347E+38 : f32
      %24 = vector.broadcast %cst_8 : f32 to vector<8x128xf32>
      %25 = arith.select %23, %24, %21 : vector<8x128xi1>, vector<8x128xf32>
      %c0_9 = arith.constant 0 : index
      %c0_10 = arith.constant 0 : index
      %26 = vector.load %arg3[%c0_9, %c0_10] : memref<8x128xf32, #tpu.memory_space<vmem>>, vector<8x128xf32>
      %cst_11 = arith.constant 0.000000e+00 : f32
      %27 = arith.cmpf one, %26, %26 : vector<8x128xf32>
      %28 = vector.broadcast %cst_11 : f32 to vector<8x128xf32>
      %29 = arith.select %27, %28, %26 : vector<8x128xi1>, vector<8x128xf32>
      %cst_12 = arith.constant 0x7F800000 : f32
      %30 = vector.broadcast %cst_12 : f32 to vector<8x128xf32>
      %31 = arith.cmpf oeq, %29, %30 : vector<8x128xf32>
      %cst_13 = arith.constant 3.40282347E+38 : f32
      %32 = vector.broadcast %cst_13 : f32 to vector<8x128xf32>
      %33 = arith.select %31, %32, %29 : vector<8x128xi1>, vector<8x128xf32>
      %cst_14 = arith.constant 0xFF800000 : f32
      %34 = vector.broadcast %cst_14 : f32 to vector<8x128xf32>
      %35 = arith.cmpf oeq, %33, %34 : vector<8x128xf32>
      %cst_15 = arith.constant -3.40282347E+38 : f32
      %36 = vector.broadcast %cst_15 : f32 to vector<8x128xf32>
      %37 = arith.select %35, %36, %33 : vector<8x128xi1>, vector<8x128xf32>
      %c0_16 = arith.constant 0 : index
      %c0_17 = arith.constant 0 : index
      %38 = vector.load %arg4[%c0_16, %c0_17] : memref<8x128xf32, #tpu.memory_space<vmem>>, vector<8x128xf32>
      %c0_18 = arith.constant 0 : index
      %c0_19 = arith.constant 0 : index
      %39 = vector.load %arg5[%c0_18, %c0_19] : memref<8x128xf32, #tpu.memory_space<vmem>>, vector<8x128xf32>
      %40 = arith.subf %37, %25 : vector<8x128xf32>
      %41 = arith.subf %38, %25 : vector<8x128xf32>
      %42 = arith.subf %39, %25 : vector<8x128xf32>
      %c0_20 = arith.constant 0 : index
      %c0_21 = arith.constant 0 : index
      %c0_22 = arith.constant 0 : index
      %c0_23 = arith.constant 0 : index
      %43 = vector.load %arg8[%c0_20, %c0_21, %c0_22, %c0_23] : memref<1x4x8x128xf32, #tpu.memory_space<vmem>>, vector<1x1x8x128xf32>
      %44 = vector.shape_cast %43 : vector<1x1x8x128xf32> to vector<8x128xf32>
      %45 = arith.mulf %40, %40 : vector<8x128xf32>
      %46 = vector.shape_cast %45 : vector<8x128xf32> to vector<1x8x128xf32>
      %cst_24 = arith.constant dense<0.000000e+00> : vector<8x128xf32>
      %47 = vector.multi_reduction <add>, %46, %cst_24 [0] : vector<1x8x128xf32> to vector<8x128xf32>
      %48 = arith.addf %44, %47 : vector<8x128xf32>
      %c0_25 = arith.constant 0 : index
      %c0_26 = arith.constant 0 : index
      %c0_27 = arith.constant 0 : index
      %c0_28 = arith.constant 0 : index
      %49 = vector.load %arg8[%c0_25, %c0_26, %c0_27, %c0_28] : memref<1x4x8x128xf32, #tpu.memory_space<vmem>>, vector<1x1x8x128xf32>
      %50 = vector.shape_cast %49 : vector<1x1x8x128xf32> to vector<8x128xf32>
      %51 = vector.shape_cast %48 : vector<8x128xf32> to vector<1x1x8x128xf32>
      tpu.vector_store %arg8[%c0_25, %c0_26, %c0_27, %c0_28], %51 {strides = array<i32>} : memref<1x4x8x128xf32, #tpu.memory_space<vmem>>, vector<1x1x8x128xf32>,
      %c0_29 = arith.constant 0 : index
      %c1 = arith.constant 1 : index
      %c0_30 = arith.constant 0 : index
      %c0_31 = arith.constant 0 : index
      %52 = vector.load %arg8[%c0_29, %c1, %c0_30, %c0_31] : memref<1x4x8x128xf32, #tpu.memory_space<vmem>>, vector<1x1x8x128xf32>
      %53 = vector.shape_cast %52 : vector<1x1x8x128xf32> to vector<8x128xf32>
      %54 = arith.mulf %41, %41 : vector<8x128xf32>
      %55 = vector.shape_cast %54 : vector<8x128xf32> to vector<1x8x128xf32>
      %cst_32 = arith.constant dense<0.000000e+00> : vector<8x128xf32>
      %56 = vector.multi_reduction <add>, %55, %cst_32 [0] : vector<1x8x128xf32> to vector<8x128xf32>
      %57 = arith.addf %53, %56 : vector<8x128xf32>
      %c0_33 = arith.constant 0 : index
      %c1_34 = arith.constant 1 : index
      %c0_35 = arith.constant 0 : index
      %c0_36 = arith.constant 0 : index
      %58 = vector.load %arg8[%c0_33, %c1_34, %c0_35, %c0_36] : memref<1x4x8x128xf32, #tpu.memory_space<vmem>>, vector<1x1x8x128xf32>
      %59 = vector.shape_cast %58 : vector<1x1x8x128xf32> to vector<8x128xf32>
      %60 = vector.shape_cast %57 : vector<8x128xf32> to vector<1x1x8x128xf32>
      tpu.vector_store %arg8[%c0_33, %c1_34, %c0_35, %c0_36], %60 {strides = array<i32>} : memref<1x4x8x128xf32, #tpu.memory_space<vmem>>, vector<1x1x8x128xf32>,
      %c0_37 = arith.constant 0 : index
      %c2 = arith.constant 2 : index
      %c0_38 = arith.constant 0 : index
      %c0_39 = arith.constant 0 : index
      %61 = vector.load %arg8[%c0_37, %c2, %c0_38, %c0_39] : memref<1x4x8x128xf32, #tpu.memory_space<vmem>>, vector<1x1x8x128xf32>
      %62 = vector.shape_cast %61 : vector<1x1x8x128xf32> to vector<8x128xf32>
      %63 = arith.mulf %42, %42 : vector<8x128xf32>
      %64 = vector.shape_cast %63 : vector<8x128xf32> to vector<1x8x128xf32>
      %cst_40 = arith.constant dense<0.000000e+00> : vector<8x128xf32>
      %65 = vector.multi_reduction <add>, %64, %cst_40 [0] : vector<1x8x128xf32> to vector<8x128xf32>
      %66 = arith.addf %62, %65 : vector<8x128xf32>
      %c0_41 = arith.constant 0 : index
      %c2_42 = arith.constant 2 : index
      %c0_43 = arith.constant 0 : index
      %c0_44 = arith.constant 0 : index
      %67 = vector.load %arg8[%c0_41, %c2_42, %c0_43, %c0_44] : memref<1x4x8x128xf32, #tpu.memory_space<vmem>>, vector<1x1x8x128xf32>
      %68 = vector.shape_cast %67 : vector<1x1x8x128xf32> to vector<8x128xf32>
      %69 = vector.shape_cast %66 : vector<8x128xf32> to vector<1x1x8x128xf32>
      tpu.vector_store %arg8[%c0_41, %c2_42, %c0_43, %c0_44], %69 {strides = array<i32>} : memref<1x4x8x128xf32, #tpu.memory_space<vmem>>, vector<1x1x8x128xf32>,
      %c0_45 = arith.constant 0 : index
      %c0_46 = arith.constant 0 : index
      %70 = vector.load %arg6[%c0_45, %c0_46] : memref<8x128xf32, #tpu.memory_space<vmem>>, vector<8x128xf32>
      %cst_47 = arith.constant 0.000000e+00 : f32
      %71 = arith.cmpf one, %70, %70 : vector<8x128xf32>
      %72 = vector.broadcast %cst_47 : f32 to vector<8x128xf32>
      %73 = arith.select %71, %72, %70 : vector<8x128xi1>, vector<8x128xf32>
      %cst_48 = arith.constant 0x7F800000 : f32
      %74 = vector.broadcast %cst_48 : f32 to vector<8x128xf32>
      %75 = arith.cmpf oeq, %73, %74 : vector<8x128xf32>
      %cst_49 = arith.constant 3.40282347E+38 : f32
      %76 = vector.broadcast %cst_49 : f32 to vector<8x128xf32>
      %77 = arith.select %75, %76, %73 : vector<8x128xi1>, vector<8x128xf32>
      %cst_50 = arith.constant 0xFF800000 : f32
      %78 = vector.broadcast %cst_50 : f32 to vector<8x128xf32>
      %79 = arith.cmpf oeq, %77, %78 : vector<8x128xf32>
      %cst_51 = arith.constant -3.40282347E+38 : f32
      %80 = vector.broadcast %cst_51 : f32 to vector<8x128xf32>
      %81 = arith.select %79, %80, %77 : vector<8x128xi1>, vector<8x128xf32>
      %c0_52 = arith.constant 0 : index
      %c0_53 = arith.constant 0 : index
      %82 = vector.load %arg7[%c0_52, %c0_53] : memref<8x128xf32, #tpu.memory_space<vmem>>, vector<8x128xf32>
      %cst_54 = arith.constant 9.99999997E-7 : f32
      %cst_55 = arith.constant 1.000000e+01 : f32
      %83 = vector.broadcast %cst_54 : f32 to vector<8x128xf32>
      %84 = arith.maximumf %83, %82 : vector<8x128xf32>
      %85 = vector.broadcast %cst_55 : f32 to vector<8x128xf32>
      %86 = arith.minimumf %85, %84 : vector<8x128xf32>
      %87 = arith.mulf %86, %86 : vector<8x128xf32>
      %cst_56 = arith.constant 6.28318548 : f32
      %88 = vector.broadcast %cst_56 : f32 to vector<8x128xf32>
      %89 = arith.mulf %88, %87 : vector<8x128xf32>
      %cst_57 = arith.constant 9.99999993E-9 : f32
      %90 = vector.broadcast %cst_57 : f32 to vector<8x128xf32>
      %91 = arith.addf %89, %90 : vector<8x128xf32>
      %92 = math.log %91 : vector<8x128xf32>
      %cst_58 = arith.constant -1.000000e+01 : f32
      %cst_59 = arith.constant 1.000000e+01 : f32
      %93 = vector.broadcast %cst_58 : f32 to vector<8x128xf32>
      %94 = arith.maximumf %93, %92 : vector<8x128xf32>
      %95 = vector.broadcast %cst_59 : f32 to vector<8x128xf32>
      %96 = arith.minimumf %95, %94 : vector<8x128xf32>
      %97 = arith.subf %25, %81 : vector<8x128xf32>
      %98 = arith.mulf %97, %97 : vector<8x128xf32>
      %cst_60 = arith.constant 9.99999993E-9 : f32
      %99 = vector.broadcast %cst_60 : f32 to vector<8x128xf32>
      %100 = arith.addf %87, %99 : vector<8x128xf32>
      %101 = arith.divf %98, %100 : vector<8x128xf32>
      %cst_61 = arith.constant 1.000000e+02 : f32
      %102 = vector.broadcast %cst_61 : f32 to vector<8x128xf32>
      %103 = arith.minimumf %101, %102 : vector<8x128xf32>
      %c0_62 = arith.constant 0 : index
      %c3 = arith.constant 3 : index
      %c0_63 = arith.constant 0 : index
      %c0_64 = arith.constant 0 : index
      %104 = vector.load %arg8[%c0_62, %c3, %c0_63, %c0_64] : memref<1x4x8x128xf32, #tpu.memory_space<vmem>>, vector<1x1x8x128xf32>
      %105 = vector.shape_cast %104 : vector<1x1x8x128xf32> to vector<8x128xf32>
      %cst_65 = arith.constant 5.000000e-01 : f32
      %106 = vector.broadcast %cst_65 : f32 to vector<8x128xf32>
      %107 = arith.mulf %106, %96 : vector<8x128xf32>
      %cst_66 = arith.constant 5.000000e-01 : f32
      %108 = vector.broadcast %cst_66 : f32 to vector<8x128xf32>
      %109 = arith.mulf %108, %103 : vector<8x128xf32>
      %110 = arith.addf %107, %109 : vector<8x128xf32>
      %111 = vector.shape_cast %110 : vector<8x128xf32> to vector<1x8x128xf32>
      %cst_67 = arith.constant dense<0.000000e+00> : vector<8x128xf32>
      %112 = vector.multi_reduction <add>, %111, %cst_67 [0] : vector<1x8x128xf32> to vector<8x128xf32>
      %113 = arith.addf %105, %112 : vector<8x128xf32>
      %c0_68 = arith.constant 0 : index
      %c3_69 = arith.constant 3 : index
      %c0_70 = arith.constant 0 : index
      %c0_71 = arith.constant 0 : index
      %114 = vector.load %arg8[%c0_68, %c3_69, %c0_70, %c0_71] : memref<1x4x8x128xf32, #tpu.memory_space<vmem>>, vector<1x1x8x128xf32>
      %115 = vector.shape_cast %114 : vector<1x1x8x128xf32> to vector<8x128xf32>
      %116 = vector.shape_cast %113 : vector<8x128xf32> to vector<1x1x8x128xf32>
      tpu.vector_store %arg8[%c0_68, %c3_69, %c0_70, %c0_71], %116 {strides = array<i32>} : memref<1x4x8x128xf32, #tpu.memory_space<vmem>>, vector<1x1x8x128xf32>,
    } else {
    }
    %true = arith.constant true
    %11 = arith.xori %8, %true : i1
    %12 = arith.extui %11 : i1 to i32
    %c0_i32_3 = arith.constant 0 : i32
    %13 = arith.cmpi ne, %12, %c0_i32_3 : i32
    scf.if %13 {
      %14 = tpu.iota {dimensions = array<i32: 0>} : vector<8x128xi32>
      %15 = vector.broadcast %5 : i32 to vector<8x128xi32>
      %16 = arith.addi %15, %14 : vector<8x128xi32>
      %17 = tpu.iota {dimensions = array<i32: 1>} : vector<8x128xi32>
      %c128_i32_4 = arith.constant 128 : i32
      %18 = vector.broadcast %c128_i32_4 : i32 to vector<8x128xi32>
      %19 = arith.muli %16, %18 : vector<8x128xi32>
      %20 = arith.addi %19, %17 : vector<8x128xi32>
      %c96_i32_5 = arith.constant 96 : i32
      %21 = vector.broadcast %c96_i32_5 : i32 to vector<8x128xi32>
      %22 = arith.cmpi slt, %20, %21 : vector<8x128xi32>
      %c0 = arith.constant 0 : index
      %c0_6 = arith.constant 0 : index
      %23 = vector.load %arg2[%c0, %c0_6] : memref<8x128xf32, #tpu.memory_space<vmem>>, vector<8x128xf32>
      %cst = arith.constant 0.000000e+00 : f32
      %24 = arith.cmpf one, %23, %23 : vector<8x128xf32>
      %25 = vector.broadcast %cst : f32 to vector<8x128xf32>
      %26 = arith.select %24, %25, %23 : vector<8x128xi1>, vector<8x128xf32>
      %cst_7 = arith.constant 0x7F800000 : f32
      %27 = vector.broadcast %cst_7 : f32 to vector<8x128xf32>
      %28 = arith.cmpf oeq, %26, %27 : vector<8x128xf32>
      %cst_8 = arith.constant 3.40282347E+38 : f32
      %29 = vector.broadcast %cst_8 : f32 to vector<8x128xf32>
      %30 = arith.select %28, %29, %26 : vector<8x128xi1>, vector<8x128xf32>
      %cst_9 = arith.constant 0xFF800000 : f32
      %31 = vector.broadcast %cst_9 : f32 to vector<8x128xf32>
      %32 = arith.cmpf oeq, %30, %31 : vector<8x128xf32>
      %cst_10 = arith.constant -3.40282347E+38 : f32
      %33 = vector.broadcast %cst_10 : f32 to vector<8x128xf32>
      %34 = arith.select %32, %33, %30 : vector<8x128xi1>, vector<8x128xf32>
      %c0_11 = arith.constant 0 : index
      %c0_12 = arith.constant 0 : index
      %35 = vector.load %arg3[%c0_11, %c0_12] : memref<8x128xf32, #tpu.memory_space<vmem>>, vector<8x128xf32>
      %cst_13 = arith.constant 0.000000e+00 : f32
      %36 = arith.cmpf one, %35, %35 : vector<8x128xf32>
      %37 = vector.broadcast %cst_13 : f32 to vector<8x128xf32>
      %38 = arith.select %36, %37, %35 : vector<8x128xi1>, vector<8x128xf32>
      %cst_14 = arith.constant 0x7F800000 : f32
      %39 = vector.broadcast %cst_14 : f32 to vector<8x128xf32>
      %40 = arith.cmpf oeq, %38, %39 : vector<8x128xf32>
      %cst_15 = arith.constant 3.40282347E+38 : f32
      %41 = vector.broadcast %cst_15 : f32 to vector<8x128xf32>
      %42 = arith.select %40, %41, %38 : vector<8x128xi1>, vector<8x128xf32>
      %cst_16 = arith.constant 0xFF800000 : f32
      %43 = vector.broadcast %cst_16 : f32 to vector<8x128xf32>
      %44 = arith.cmpf oeq, %42, %43 : vector<8x128xf32>
      %cst_17 = arith.constant -3.40282347E+38 : f32
      %45 = vector.broadcast %cst_17 : f32 to vector<8x128xf32>
      %46 = arith.select %44, %45, %42 : vector<8x128xi1>, vector<8x128xf32>
      %c0_18 = arith.constant 0 : index
      %c0_19 = arith.constant 0 : index
      %47 = vector.load %arg4[%c0_18, %c0_19] : memref<8x128xf32, #tpu.memory_space<vmem>>, vector<8x128xf32>
      %c0_20 = arith.constant 0 : index
      %c0_21 = arith.constant 0 : index
      %48 = vector.load %arg5[%c0_20, %c0_21] : memref<8x128xf32, #tpu.memory_space<vmem>>, vector<8x128xf32>
      %49 = arith.subf %46, %34 : vector<8x128xf32>
      %50 = arith.subf %47, %34 : vector<8x128xf32>
      %51 = arith.subf %48, %34 : vector<8x128xf32>
      %c0_22 = arith.constant 0 : index
      %c0_23 = arith.constant 0 : index
      %c0_24 = arith.constant 0 : index
      %c0_25 = arith.constant 0 : index
      %52 = vector.load %arg8[%c0_22, %c0_23, %c0_24, %c0_25] : memref<1x4x8x128xf32, #tpu.memory_space<vmem>>, vector<1x1x8x128xf32>
      %53 = vector.shape_cast %52 : vector<1x1x8x128xf32> to vector<8x128xf32>
      %54 = arith.mulf %49, %49 : vector<8x128xf32>
      %cst_26 = arith.constant 0.000000e+00 : f32
      %55 = vector.broadcast %cst_26 : f32 to vector<8x128xf32>
      %56 = arith.select %22, %54, %55 : vector<8x128xi1>, vector<8x128xf32>
      %57 = vector.shape_cast %56 : vector<8x128xf32> to vector<1x8x128xf32>
      %cst_27 = arith.constant dense<0.000000e+00> : vector<8x128xf32>
      %58 = vector.multi_reduction <add>, %57, %cst_27 [0] : vector<1x8x128xf32> to vector<8x128xf32>
      %59 = arith.addf %53, %58 : vector<8x128xf32>
      %c0_28 = arith.constant 0 : index
      %c0_29 = arith.constant 0 : index
      %c0_30 = arith.constant 0 : index
      %c0_31 = arith.constant 0 : index
      %60 = vector.load %arg8[%c0_28, %c0_29, %c0_30, %c0_31] : memref<1x4x8x128xf32, #tpu.memory_space<vmem>>, vector<1x1x8x128xf32>
      %61 = vector.shape_cast %60 : vector<1x1x8x128xf32> to vector<8x128xf32>
      %62 = vector.shape_cast %59 : vector<8x128xf32> to vector<1x1x8x128xf32>
      tpu.vector_store %arg8[%c0_28, %c0_29, %c0_30, %c0_31], %62 {strides = array<i32>} : memref<1x4x8x128xf32, #tpu.memory_space<vmem>>, vector<1x1x8x128xf32>,
      %c0_32 = arith.constant 0 : index
      %c1 = arith.constant 1 : index
      %c0_33 = arith.constant 0 : index
      %c0_34 = arith.constant 0 : index
      %63 = vector.load %arg8[%c0_32, %c1, %c0_33, %c0_34] : memref<1x4x8x128xf32, #tpu.memory_space<vmem>>, vector<1x1x8x128xf32>
      %64 = vector.shape_cast %63 : vector<1x1x8x128xf32> to vector<8x128xf32>
      %65 = arith.mulf %50, %50 : vector<8x128xf32>
      %cst_35 = arith.constant 0.000000e+00 : f32
      %66 = vector.broadcast %cst_35 : f32 to vector<8x128xf32>
      %67 = arith.select %22, %65, %66 : vector<8x128xi1>, vector<8x128xf32>
      %68 = vector.shape_cast %67 : vector<8x128xf32> to vector<1x8x128xf32>
      %cst_36 = arith.constant dense<0.000000e+00> : vector<8x128xf32>
      %69 = vector.multi_reduction <add>, %68, %cst_36 [0] : vector<1x8x128xf32> to vector<8x128xf32>
      %70 = arith.addf %64, %69 : vector<8x128xf32>
      %c0_37 = arith.constant 0 : index
      %c1_38 = arith.constant 1 : index
      %c0_39 = arith.constant 0 : index
      %c0_40 = arith.constant 0 : index
      %71 = vector.load %arg8[%c0_37, %c1_38, %c0_39, %c0_40] : memref<1x4x8x128xf32, #tpu.memory_space<vmem>>, vector<1x1x8x128xf32>
      %72 = vector.shape_cast %71 : vector<1x1x8x128xf32> to vector<8x128xf32>
      %73 = vector.shape_cast %70 : vector<8x128xf32> to vector<1x1x8x128xf32>
      tpu.vector_store %arg8[%c0_37, %c1_38, %c0_39, %c0_40], %73 {strides = array<i32>} : memref<1x4x8x128xf32, #tpu.memory_space<vmem>>, vector<1x1x8x128xf32>,
      %c0_41 = arith.constant 0 : index
      %c2 = arith.constant 2 : index
      %c0_42 = arith.constant 0 : index
      %c0_43 = arith.constant 0 : index
      %74 = vector.load %arg8[%c0_41, %c2, %c0_42, %c0_43] : memref<1x4x8x128xf32, #tpu.memory_space<vmem>>, vector<1x1x8x128xf32>
      %75 = vector.shape_cast %74 : vector<1x1x8x128xf32> to vector<8x128xf32>
      %76 = arith.mulf %51, %51 : vector<8x128xf32>
      %cst_44 = arith.constant 0.000000e+00 : f32
      %77 = vector.broadcast %cst_44 : f32 to vector<8x128xf32>
      %78 = arith.select %22, %76, %77 : vector<8x128xi1>, vector<8x128xf32>
      %79 = vector.shape_cast %78 : vector<8x128xf32> to vector<1x8x128xf32>
      %cst_45 = arith.constant dense<0.000000e+00> : vector<8x128xf32>
      %80 = vector.multi_reduction <add>, %79, %cst_45 [0] : vector<1x8x128xf32> to vector<8x128xf32>
      %81 = arith.addf %75, %80 : vector<8x128xf32>
      %c0_46 = arith.constant 0 : index
      %c2_47 = arith.constant 2 : index
      %c0_48 = arith.constant 0 : index
      %c0_49 = arith.constant 0 : index
      %82 = vector.load %arg8[%c0_46, %c2_47, %c0_48, %c0_49] : memref<1x4x8x128xf32, #tpu.memory_space<vmem>>, vector<1x1x8x128xf32>
      %83 = vector.shape_cast %82 : vector<1x1x8x128xf32> to vector<8x128xf32>
      %84 = vector.shape_cast %81 : vector<8x128xf32> to vector<1x1x8x128xf32>
      tpu.vector_store %arg8[%c0_46, %c2_47, %c0_48, %c0_49], %84 {strides = array<i32>} : memref<1x4x8x128xf32, #tpu.memory_space<vmem>>, vector<1x1x8x128xf32>,
      %c0_50 = arith.constant 0 : index
      %c0_51 = arith.constant 0 : index
      %85 = vector.load %arg6[%c0_50, %c0_51] : memref<8x128xf32, #tpu.memory_space<vmem>>, vector<8x128xf32>
      %cst_52 = arith.constant 0.000000e+00 : f32
      %86 = arith.cmpf one, %85, %85 : vector<8x128xf32>
      %87 = vector.broadcast %cst_52 : f32 to vector<8x128xf32>
      %88 = arith.select %86, %87, %85 : vector<8x128xi1>, vector<8x128xf32>
      %cst_53 = arith.constant 0x7F800000 : f32
      %89 = vector.broadcast %cst_53 : f32 to vector<8x128xf32>
      %90 = arith.cmpf oeq, %88, %89 : vector<8x128xf32>
      %cst_54 = arith.constant 3.40282347E+38 : f32
      %91 = vector.broadcast %cst_54 : f32 to vector<8x128xf32>
      %92 = arith.select %90, %91, %88 : vector<8x128xi1>, vector<8x128xf32>
      %cst_55 = arith.constant 0xFF800000 : f32
      %93 = vector.broadcast %cst_55 : f32 to vector<8x128xf32>
      %94 = arith.cmpf oeq, %92, %93 : vector<8x128xf32>
      %cst_56 = arith.constant -3.40282347E+38 : f32
      %95 = vector.broadcast %cst_56 : f32 to vector<8x128xf32>
      %96 = arith.select %94, %95, %92 : vector<8x128xi1>, vector<8x128xf32>
      %c0_57 = arith.constant 0 : index
      %c0_58 = arith.constant 0 : index
      %97 = vector.load %arg7[%c0_57, %c0_58] : memref<8x128xf32, #tpu.memory_space<vmem>>, vector<8x128xf32>
      %cst_59 = arith.constant 9.99999997E-7 : f32
      %cst_60 = arith.constant 1.000000e+01 : f32
      %98 = vector.broadcast %cst_59 : f32 to vector<8x128xf32>
      %99 = arith.maximumf %98, %97 : vector<8x128xf32>
      %100 = vector.broadcast %cst_60 : f32 to vector<8x128xf32>
      %101 = arith.minimumf %100, %99 : vector<8x128xf32>
      %102 = arith.mulf %101, %101 : vector<8x128xf32>
      %cst_61 = arith.constant 6.28318548 : f32
      %103 = vector.broadcast %cst_61 : f32 to vector<8x128xf32>
      %104 = arith.mulf %103, %102 : vector<8x128xf32>
      %cst_62 = arith.constant 9.99999993E-9 : f32
      %105 = vector.broadcast %cst_62 : f32 to vector<8x128xf32>
      %106 = arith.addf %104, %105 : vector<8x128xf32>
      %107 = math.log %106 : vector<8x128xf32>
      %cst_63 = arith.constant -1.000000e+01 : f32
      %cst_64 = arith.constant 1.000000e+01 : f32
      %108 = vector.broadcast %cst_63 : f32 to vector<8x128xf32>
      %109 = arith.maximumf %108, %107 : vector<8x128xf32>
      %110 = vector.broadcast %cst_64 : f32 to vector<8x128xf32>
      %111 = arith.minimumf %110, %109 : vector<8x128xf32>
      %112 = arith.subf %34, %96 : vector<8x128xf32>
      %113 = arith.mulf %112, %112 : vector<8x128xf32>
      %cst_65 = arith.constant 9.99999993E-9 : f32
      %114 = vector.broadcast %cst_65 : f32 to vector<8x128xf32>
      %115 = arith.addf %102, %114 : vector<8x128xf32>
      %116 = arith.divf %113, %115 : vector<8x128xf32>
      %cst_66 = arith.constant 1.000000e+02 : f32
      %117 = vector.broadcast %cst_66 : f32 to vector<8x128xf32>
      %118 = arith.minimumf %116, %117 : vector<8x128xf32>
      %c0_67 = arith.constant 0 : index
      %c3 = arith.constant 3 : index
      %c0_68 = arith.constant 0 : index
      %c0_69 = arith.constant 0 : index
      %119 = vector.load %arg8[%c0_67, %c3, %c0_68, %c0_69] : memref<1x4x8x128xf32, #tpu.memory_space<vmem>>, vector<1x1x8x128xf32>
      %120 = vector.shape_cast %119 : vector<1x1x8x128xf32> to vector<8x128xf32>
      %cst_70 = arith.constant 5.000000e-01 : f32
      %121 = vector.broadcast %cst_70 : f32 to vector<8x128xf32>
      %122 = arith.mulf %121, %111 : vector<8x128xf32>
      %cst_71 = arith.constant 5.000000e-01 : f32
      %123 = vector.broadcast %cst_71 : f32 to vector<8x128xf32>
      %124 = arith.mulf %123, %118 : vector<8x128xf32>
      %125 = arith.addf %122, %124 : vector<8x128xf32>
      %cst_72 = arith.constant 0.000000e+00 : f32
      %126 = vector.broadcast %cst_72 : f32 to vector<8x128xf32>
      %127 = arith.select %22, %125, %126 : vector<8x128xi1>, vector<8x128xf32>
      %128 = vector.shape_cast %127 : vector<8x128xf32> to vector<1x8x128xf32>
      %cst_73 = arith.constant dense<0.000000e+00> : vector<8x128xf32>
      %129 = vector.multi_reduction <add>, %128, %cst_73 [0] : vector<1x8x128xf32> to vector<8x128xf32>
      %130 = arith.addf %120, %129 : vector<8x128xf32>
      %c0_74 = arith.constant 0 : index
      %c3_75 = arith.constant 3 : index
      %c0_76 = arith.constant 0 : index
      %c0_77 = arith.constant 0 : index
      %131 = vector.load %arg8[%c0_74, %c3_75, %c0_76, %c0_77] : memref<1x4x8x128xf32, #tpu.memory_space<vmem>>, vector<1x1x8x128xf32>
      %132 = vector.shape_cast %131 : vector<1x1x8x128xf32> to vector<8x128xf32>
      %133 = vector.shape_cast %130 : vector<8x128xf32> to vector<1x1x8x128xf32>
      tpu.vector_store %arg8[%c0_74, %c3_75, %c0_76, %c0_77], %133 {strides = array<i32>} : memref<1x4x8x128xf32, #tpu.memory_space<vmem>>, vector<1x1x8x128xf32>,
    } else {
    }
    return
  }
  func.func @transform_0(%arg0: i32, %arg1: i32) -> (i32, i32) {
    %c1_i32 = arith.constant 1 : i32
    %0 = arith.muli %arg0, %c1_i32 : i32
    %1 = arith.addi %0, %arg1 : i32
    %c0_i32 = arith.constant 0 : i32
    %2 = arith.minsi %1, %c0_i32 : i32
    %c0_i32_0 = arith.constant 0 : i32
    %c0_i32_1 = arith.constant 0 : i32
    return %2, %c0_i32_0 : i32, i32
  }
  func.func @transform_1(%arg0: i32, %arg1: i32) -> (i32, i32) {
    %c1_i32 = arith.constant 1 : i32
    %0 = arith.muli %arg0, %c1_i32 : i32
    %1 = arith.addi %0, %arg1 : i32
    %c0_i32 = arith.constant 0 : i32
    %2 = arith.minsi %1, %c0_i32 : i32
    %c0_i32_0 = arith.constant 0 : i32
    %c0_i32_1 = arith.constant 0 : i32
    return %2, %c0_i32_0 : i32, i32
  }
  func.func @transform_2(%arg0: i32, %arg1: i32) -> (i32, i32) {
    %c1_i32 = arith.constant 1 : i32
    %0 = arith.muli %arg0, %c1_i32 : i32
    %1 = arith.addi %0, %arg1 : i32
    %c0_i32 = arith.constant 0 : i32
    %2 = arith.minsi %1, %c0_i32 : i32
    %c0_i32_0 = arith.constant 0 : i32
    %c0_i32_1 = arith.constant 0 : i32
    return %2, %c0_i32_0 : i32, i32
  }
  func.func @transform_3(%arg0: i32, %arg1: i32) -> (i32, i32) {
    %c1_i32 = arith.constant 1 : i32
    %0 = arith.muli %arg0, %c1_i32 : i32
    %1 = arith.addi %0, %arg1 : i32
    %c0_i32 = arith.constant 0 : i32
    %2 = arith.minsi %1, %c0_i32 : i32
    %c0_i32_0 = arith.constant 0 : i32
    %c0_i32_1 = arith.constant 0 : i32
    return %2, %c0_i32_0 : i32, i32
  }
  func.func @transform_4(%arg0: i32, %arg1: i32) -> (i32, i32) {
    %c1_i32 = arith.constant 1 : i32
    %0 = arith.muli %arg0, %c1_i32 : i32
    %1 = arith.addi %0, %arg1 : i32
    %c0_i32 = arith.constant 0 : i32
    %2 = arith.minsi %1, %c0_i32 : i32
    %c0_i32_0 = arith.constant 0 : i32
    %c0_i32_1 = arith.constant 0 : i32
    return %2, %c0_i32_0 : i32, i32
  }
  func.func @transform_5(%arg0: i32, %arg1: i32) -> (i32, i32) {
    %c1_i32 = arith.constant 1 : i32
    %0 = arith.muli %arg0, %c1_i32 : i32
    %1 = arith.addi %0, %arg1 : i32
    %c0_i32 = arith.constant 0 : i32
    %2 = arith.minsi %1, %c0_i32 : i32
    %c0_i32_0 = arith.constant 0 : i32
    %c0_i32_1 = arith.constant 0 : i32
    return %2, %c0_i32_0 : i32, i32
  }
  func.func @transform_6(%arg0: i32, %arg1: i32) -> (i32, i32, i32, i32) {
    %c0_i32 = arith.constant 0 : i32
    %c0_i32_0 = arith.constant 0 : i32
    %c0_i32_1 = arith.constant 0 : i32
    %c0_i32_2 = arith.constant 0 : i32
    return %arg0, %c0_i32, %c0_i32_0, %c0_i32_1 : i32, i32, i32, i32
  }
}

</mosaic_0001>

<bundles_post_ra>
// kernel: tpu_custom_call.1
= control target key start
LH: loop header
LB: loop body
LE: loop exit
PB: predicated region body
PF: predicated region fallthrough
CT: control target
= control target key end

     0   :  { %11 = vsyncpa [#allocation3], 0  ;;  %s607_s0 = inlined_call_operand.hbm [shape: f32[8,128], index: 0, kind: input, shape index: {}]   ;;  %s608_s1 = inlined_call_operand.hbm [shape: f32[8,128], index: 1, kind: input, shape index: {}]   ;;  %s609_s2 = inlined_call_operand.hbm [shape: f32[8,128], index: 2, kind: input, shape index: {}]   ;;  %s610_s3 = inlined_call_operand.vmem [shape: f32[8,128], index: 3, kind: input, shape index: {}]   ;;  %s611_s4 = inlined_call_operand.hbm [shape: f32[8,128], index: 4, kind: input, shape index: {}]   ;;  %s612_s5 = inlined_call_operand.vmem [shape: f32[8,128], index: 5, kind: input, shape index: {}]   ;;  %s613_s6 = inlined_call_operand.hbm [shape: f32[1,4,8,128], index: 6, kind: output, shape index: {}]  }
   0x1   :  { %12 = vsyncpa [#allocation6], 0 }
   0x2   :  { %13 = vsyncpa [#allocation9], 0 }
   0x3   :  { %14 = vsyncpa [#allocation4], 0  ;;  %s495_s21 = smov [#allocation5]   ;;  %s496_s23 = smov [#allocation2]  }
   0x4   :  { %s41_s22 = sshll.u32 %s495_s21, 4  ;;  %s26_s24 = sshll.u32 %s496_s23, 4  ;;  %s42_s22 = int_to_ptr.vmem [resolvable:$true] %s41_s22  ;;  %s27_s24 = int_to_ptr.vmem [resolvable:$true] %s26_s24 }
   0x5   :  { %s377_s27 = scalar_lea.hbm %s608_s1, 128 }
   0x6   :  { %p378_p0 = scmp.ne.s32.totalorder %s608_s1, %s377_s27  ;;  %p381_p1 = scmp.lt.u32.totalorder %s377_s27, %s608_s1 }
   0x8   :  { %p383_p2 = pnand %p381_p1, %p378_p0 }
   0xa   :  { %386 = shalt.err (!%p383_p2)
}
   0xb   :  { %s387_s8 = scalar_lea.vmem %s42_s22, 128  ;;  %p392_p4 = scmp.lt.s32.totalorder %s42_s22, %s42_s22 }
   0xc   :  { %p388_p3 = scmp.ne.s32.totalorder %s42_s22, %s387_s8  ;;  %p393_p5 = scmp.lt.s32.totalorder %s387_s8, %s387_s8 }
   0xe   :  { %p394_p6 = por %p393_p5, %p392_p4 }
  0x10   :  { %p395_p7 = pnand %p394_p6, %p388_p3 }
  0x12   :  { %398 = shalt.err (!%p395_p7)
}
  0x13   :  { %44 = dma.hbm_to_vmem [thread:$0]  %s608_s1, 128, %s42_s22, [#allocation6]  }
  0x14   :  { %s399_s13 = scalar_lea.hbm %s607_s0, 128 }
  0x15   :  { %p400_p8 = scmp.ne.s32.totalorder %s607_s0, %s399_s13  ;;  %p403_p9 = scmp.lt.u32.totalorder %s399_s13, %s607_s0 }
  0x17   :  { %p405_p10 = pnand %p403_p9, %p400_p8 }
  0x19   :  { %408 = shalt.err (!%p405_p10)
}
  0x1a   :  { %s409_s18 = scalar_lea.vmem %s27_s24, 128  ;;  %p414_p12 = scmp.lt.s32.totalorder %s27_s24, %s27_s24 }
  0x1b   :  { %p410_p11 = scmp.ne.s32.totalorder %s27_s24, %s409_s18  ;;  %p415_p13 = scmp.lt.s32.totalorder %s409_s18, %s409_s18 }
  0x1d   :  { %p416_p0 = por %p415_p13, %p414_p12 }
  0x1f   :  { %p417_p1 = pnand %p416_p0, %p410_p11 }
  0x21   :  { %420 = shalt.err (!%p417_p1)
}
  0x22   :  { %29 = dma.hbm_to_vmem [thread:$0]  %s607_s0, 128, %s27_s24, [#allocation3]  }
  0x23   :  { %s497_s20 = smov [#allocation7]   ;;  %s498_s22 = smov [#allocation8]  }
  0x24   :  { %s56_s21 = sshll.u32 %s497_s20, 4  ;;  %s83_s23 = sshll.u32 %s498_s22, 4  ;;  %s57_s21 = int_to_ptr.vmem [resolvable:$true] %s56_s21  ;;  %s84_s23 = int_to_ptr.vmem [resolvable:$true] %s83_s23 }
  0x25   :  { %s421_s27 = scalar_lea.hbm %s609_s2, 128 }
  0x26   :  { %p422_p2 = scmp.ne.s32.totalorder %s609_s2, %s421_s27  ;;  %p425_p3 = scmp.lt.u32.totalorder %s421_s27, %s609_s2 }
  0x28   :  { %p427_p4 = pnand %p425_p3, %p422_p2 }
  0x2a   :  { %430 = shalt.err (!%p427_p4)
}
  0x2b   :  { %s431_s0 = scalar_lea.vmem %s57_s21, 128  ;;  %p436_p6 = scmp.lt.s32.totalorder %s57_s21, %s57_s21 }
  0x2c   :  { %p432_p5 = scmp.ne.s32.totalorder %s57_s21, %s431_s0  ;;  %p437_p7 = scmp.lt.s32.totalorder %s431_s0, %s431_s0 }
  0x2e   :  { %p438_p8 = por %p437_p7, %p436_p6 }
  0x30   :  { %p439_p9 = pnand %p438_p8, %p432_p5 }
  0x32   :  { %442 = shalt.err (!%p439_p9)
}
  0x33   :  { %59 = dma.hbm_to_vmem [thread:$0]  %s609_s2, 128, %s57_s21, [#allocation6]  }
  0x34   :  { %s443_s11 = scalar_lea.hbm %s611_s4, 128 }
  0x35   :  { %p444_p10 = scmp.ne.s32.totalorder %s611_s4, %s443_s11  ;;  %p447_p11 = scmp.lt.u32.totalorder %s443_s11, %s611_s4 }
  0x37   :  { %p449_p12 = pnand %p447_p11, %p444_p10 }
  0x39   :  { %452 = shalt.err (!%p449_p12)
}
  0x3a   :  { %s453_s16 = scalar_lea.vmem %s84_s23, 128  ;;  %p458_p0 = scmp.lt.s32.totalorder %s84_s23, %s84_s23 }
  0x3b   :  { %p454_p13 = scmp.ne.s32.totalorder %s84_s23, %s453_s16  ;;  %p459_p1 = scmp.lt.s32.totalorder %s453_s16, %s453_s16 }
  0x3d   :  { %p460_p2 = por %p459_p1, %p458_p0 }
  0x3f   :  { %p461_p3 = pnand %p460_p2, %p454_p13 }
  0x41   :  { %464 = shalt.err (!%p461_p3)
}
  0x42   :  { %86 = dma.hbm_to_vmem [thread:$0]  %s611_s4, 128, %s84_s23, [#allocation9]  }
  0x43   :  { %487 = dma.done.wait [#allocation3], 128  }
  0x44   :  { %488 = vsyncadd [#allocation3], 4294967168 }
  0x45   :  { %489 = dma.done.wait [#allocation6], 256  }
  0x46   :  { %490 = vsyncadd [#allocation6], 4294967040 }
  0x47   :  { %491 = dma.done.wait [#allocation9], 128  }
  0x48   :  { %492 = vsyncadd [#allocation9], 4294967168  ;;  %v244_v0 = vlaneseq  ;;  %v253_v4 = vld [vmem:[#allocation2] sm:$0xff]  ;;  %v260_v5 = vld [vmem:[#allocation5] sm:$0xff] }
  0x49   :  { %vm254_vm0 = vcmp.ne.f32.partialorder %v253_v4, %v253_v4  ;;  %vm261_vm1 = vcmp.ne.f32.partialorder %v260_v5, %v260_v5  ;;  %v292_v6 = vld [vmem:[#allocation8] sm:$0xff]  ;;  %v299_v7 = vld [vmem:[%s612_s5] sm:$0xff]  ;;  %v267_v12 = vld [vmem:[#allocation7] sm:$0xff] }
  0x4a   :  { %v245_v1 = vshrl.u32 %v244_v0, 7  ;;  %v249_v2 = vand.u32 127, %v244_v0  ;;  %v255_v8 = vsel %vm254_vm0, 0.0, %v253_v4  ;;  %v262_v9 = vsel %vm261_vm1, 0.0, %v260_v5  ;;  %v268_v13 = vld [vmem:[%s610_s3] sm:$0xff]  ;;  %s499_s3 = smov [#allocation10]  }
  0x4b   :  { %vm293_vm2 = vcmp.ne.f32.partialorder %v292_v6, %v292_v6  ;;  %v300_v10 = vmax.f32 %v299_v7, 1e-06  ;;  %vm256_vm3 = vcmp.eq.f32.partialorder %v255_v8, inf  ;;  %vm263_vm4 = vcmp.eq.f32.partialorder %v262_v9, inf  ;;  %s329_s5 = sshll.u32 %s499_s3, 4  ;;  %s330_s5 = int_to_ptr.vmem [resolvable:$true] %s329_s5 }
  0x4c   :  { %v250_v3 = vmul.u32 128, %v245_v1  ;;  %v294_v14 = vsel %vm293_vm2, 0.0, %v292_v6  ;;  %v257_v15 = vsel %vm256_vm3, 3.4028235e+38, %v255_v8  ;;  %v264_v16 = vsel %vm263_vm4, 3.4028235e+38, %v262_v9  ;;  %p470_p5 = scmp.lt.s32.totalorder %s330_s5, %s330_s5 }
  0x4d   :  { %vm295_vm5 = vcmp.eq.f32.partialorder %v294_v14, inf  ;;  %v301_v17 = vmin.f32 %v300_v10, 10.0  ;;  %vm258_vm6 = vcmp.eq.f32.partialorder %v257_v15, -inf  ;;  %vm265_vm7 = vcmp.eq.f32.partialorder %v264_v16, -inf  ;;  %s465_s20 = scalar_lea.vmem %s330_s5, 512 }
  0x4e   :  { %v251_v11 = vadd.s32 %v250_v3, %v249_v2  ;;  %v296_v18 = vsel %vm295_vm5, 3.4028235e+38, %v294_v14  ;;  %v259_v19 = vsel %vm258_vm6, -3.4028235e+38, %v257_v15  ;;  %v266_v20 = vsel %vm265_vm7, -3.4028235e+38, %v264_v16  ;;  %p466_p4 = scmp.ne.s32.totalorder %s330_s5, %s465_s20  ;;  %p471_p6 = scmp.lt.s32.totalorder %s465_s20, %s465_s20 }
  0x4f   :  { %v302_v21 = vmul.f32 %v301_v17, %v301_v17  ;;  %v269_v22 = vsub.f32 %v266_v20, %v259_v19  ;;  %v270_v23 = vsub.f32 %v267_v12, %v259_v19  ;;  %v271_v24 = vsub.f32 %v268_v13, %v259_v19 }
  0x50   :  { %vm297_vm8 = vcmp.eq.f32.partialorder %v296_v18, -inf  ;;  %vm252_vm9 = vcmp.lt.s32.totalorder %v251_v11, 96  ;;  %p472_p7 = por %p471_p6, %p470_p5 }
  0x51   :  { %v303_v25 = vmul.f32 6.2831855, %v302_v21  ;;  %v311_v26 = vadd.f32 1e-08, %v302_v21  ;;  %v273_v27 = vmul.f32 %v269_v22, %v269_v22  ;;  %v280_v28 = vmul.f32 %v270_v23, %v270_v23 }
  0x52   :  { %v287_v29 = vmul.f32 %v271_v24, %v271_v24  ;;  %v298_v30 = vsel %vm297_vm8, -3.4028235e+38, %v296_v18  ;;  %p473_p8 = pnand %p472_p7, %p466_p4 }
  0x53   :  { %v304_v31 = vadd.f32 1e-08, %v303_v25  ;;  %373 = vrcp.f32 %v311_v26  ;;  %v274_v32 = vsel %vm252_vm9, %v273_v27, 0.0  ;;  %v281_v33 = vsel %vm252_vm9, %v280_v28, 0.0 }
  0x54   :  { %v288_v34 = vsel %vm252_vm9, %v287_v29, 0.0  ;;  %v309_v35 = vsub.f32 %v259_v19, %v298_v30  ;;  %277 = vst [vmem:[#allocation10] sm:$0xff] %v274_v32  ;;  %284 = vst [vmem:[#allocation10 + $0x8] sm:$0xff] %v281_v33 }
  0x55   :  { %375 = vlog2.f32 %v304_v31  ;;  %291 = vst [vmem:[#allocation10 + $0x10] sm:$0xff] %v288_v34 }
  0x56   :  { %v310_v36 = vmul.f32 %v309_v35, %v309_v35 }
  0x5d   :  { %v374_v37 = vpop.eup %373 }
  0x5e   :  { %v313_v38 = vmul.f32 %v374_v37, %v310_v36 }
  0x5f   :  { %v376_v39 = vpop.eup %375 }
  0x60   :  { %v306_v40 = vmul.f32 0.6931472, %v376_v39  ;;  %v314_v41 = vmin.f32 %v313_v38, 100.0 }
  0x62   :  { %v364_v42 = vclamps-f32 %v306_v40, 10.0  ;;  %v318_v43 = vmul.f32 0.5, %v314_v41 }
  0x64   :  { %v317_v44 = vmul.f32 0.5, %v364_v42 }
  0x66   :  { %v319_v45 = vadd.f32 %v318_v43, %v317_v44 }
  0x68   :  { %v320_v46 = vsel %vm252_vm9, %v319_v45, 0.0 }
  0x69   :  { %323 = vst [vmem:[#allocation10 + $0x18] sm:$0xff] %v320_v46 }
  0x6a   :  { %476 = shalt.err (!%p473_p8)
}
  0x6b   :  { %s477_s23 = scalar_lea.hbm %s613_s6, 512 }
  0x6c   :  { %p478_p9 = scmp.ne.s32.totalorder %s613_s6, %s477_s23  ;;  %p481_p10 = scmp.lt.u32.totalorder %s477_s23, %s613_s6 }
  0x6e   :  { %p483_p11 = pnand %p481_p10, %p478_p9 }
  0x70   :  { %486 = shalt.err (!%p483_p11)
}
  0x71   :  { %s500_s29 = smov 128   ;;  %s501_s30 = smov 8  }
  0x72   :  { %335 = dma.vmem_to_hbm [thread:$0]  %s330_s5, 512, %s613_s6, [#allocation4], %s500_s29, %s500_s29, %s501_s30  }
  0x73   :  { %493 = dma.done.wait [#allocation4], 512  }
  0x74   :  { %494 = vsyncadd [#allocation4], 4294966784 }
  0x75   :  { %339 = vsyncpa [#allocation3], 1 }
  0x76   :  { %340 = vsyncpa [#allocation6], 1 }
  0x77   :  { %341 = vsyncpa [#allocation9], 1 }
  0x78   :  { %342 = vsyncpa [#allocation4], 1 }

</bundles_post_ra>
